<compile_context>
chip_gen: v6e
topology: v6e:2x2x1
jax: 0.10.0
libtpu: 0.0.40
codegen_flags: <defaults>
</compile_context>

<pallas_src>
import math

import jax
import jax.numpy as jnp
from jax.experimental import pallas as pl
from jax.experimental.pallas import tpu as pltpu


# ----------------------------------------------------------------------------- helpers

def _build_pe_table(embedding_dim: int, max_len: int, dtype=jnp.float32):
    """Deterministic sinusoidal table, identical to the PyTorch __init__ buffer."""
    assert embedding_dim % 2 == 0, "sinusoidal PE requires an even embedding_dim"
    position = jnp.arange(0, max_len, dtype=jnp.float32)[:, None]            # (L, 1)
    div_term = jnp.exp(
        jnp.arange(0, embedding_dim, 2, dtype=jnp.float32)
        * (-math.log(10000.0) / embedding_dim)
    )                                                                        # (D/2,)
    pe = jnp.zeros((max_len, embedding_dim), dtype=jnp.float32)
    pe = pe.at[:, 0::2].set(jnp.sin(position * div_term))
    pe = pe.at[:, 1::2].set(jnp.cos(position * div_term))
    return pe.astype(dtype)                                                  # (L, D)


def _round_up(v: int, m: int) -> int:
    return (v + m - 1) // m * m


def _sublanes(dtype) -> int:
    """Sublane packing factor: f32 -> 8, bf16/f16 -> 16, int8/fp8 -> 32."""
    itemsize = jnp.dtype(dtype).itemsize
    return max(8, (4 // max(1, itemsize)) * 8)


def _generation_defaults():
    """(target x-block bytes, explicit scoped-VMEM limit bytes) per TPU generation."""
    kind = ""
    try:
        kind = jax.devices()[0].device_kind.lower()
    except Exception:  # pragma: no cover - defensive
        pass
    if "v5" in kind:
        # v5e: ~0.8 TB/s HBM; 2 MiB blocks already amortize the ~0.35 us step cost.
        return 2 * 1024 * 1024, 48 * 1024 * 1024
    if "v6" in kind:
        # v6e: 128 MiB physical VMEM, plenty of headroom for bigger blocks.
        return 6 * 1024 * 1024, 64 * 1024 * 1024
    # v7x (64 MiB physical VMEM / TC) or unknown: bigger blocks, limit well under physical.
    return 4 * 1024 * 1024, 44 * 1024 * 1024


# ----------------------------------------------------------------------------- kernel

def _pe_add_kernel(x_ref, pe_ref, o_ref):
    # Elementwise add on the VPU; casts happen in-register (free, DMA-bound kernel).
    # Broadcasting covers both layouts:
    #   Path A: x (1, tile_s, D) + pe (tile_s, D) -> (1, tile_s, D)
    #   Path B: x (B, tile_n)    + pe (1, tile_n) -> (B, tile_n)
    o_ref[...] = (x_ref[...].astype(jnp.float32)
                  + pe_ref[...].astype(jnp.float32)).astype(o_ref.dtype)


# ----------------------------------------------------------------------------- wrapper

def positional_encoding(x: jax.Array, pe_full: jax.Array, *,
                        target_block_bytes: int | None = None,
                        vmem_limit_bytes: int | None = None,
                        min_pallas_bytes: int = 1 << 20,
                        donate_x: bool = False) -> jax.Array:
    """x: (B, S, D); pe_full: (max_len, D) buffer. Returns x + pe[:S] (promoted dtype)."""
    b, s, d = x.shape
    max_len, d_pe = pe_full.shape
    assert d_pe == d, "pe table embedding_dim mismatch"
    assert s <= max_len, "sequence length exceeds max_len of the pe buffer"

    out_dtype = jnp.promote_types(x.dtype, pe_full.dtype)   # PyTorch x + f32 buffer promotion
    n = s * d
    x_item = jnp.dtype(x.dtype).itemsize
    o_item = jnp.dtype(out_dtype).itemsize
    pe_item = jnp.dtype(pe_full.dtype).itemsize

    # Tiny-shape fallback: fused XLA add beats the pallas_call fixed cost, and n < 128
    # can never be lane-dense anyway.
    if n < 128 or b * n * (x_item + o_item) < min_pallas_bytes:
        return (x + pe_full[None, :s, :]).astype(out_dtype)

    gen_block, gen_vmem = _generation_defaults()
    if target_block_bytes is None:
        target_block_bytes = gen_block
    if vmem_limit_bytes is None:
        vmem_limit_bytes = gen_vmem
    vmem_budget = int(vmem_limit_bytes * 0.85)   # headroom for Mosaic internal scratch

    sub_x, sub_o, sub_pe = _sublanes(x.dtype), _sublanes(out_dtype), _sublanes(pe_full.dtype)
    tile_align = max(sub_x, sub_o, sub_pe)
    min_steps = 8    # feed both v7x TensorCores; negligible cost elsewhere

    cost = pl.CostEstimate(
        flops=b * n,
        transcendentals=0,
        bytes_accessed=b * n * (x_item + o_item) + n * pe_item,   # pe read once (batch-invariant)
    )
    alias = {0: 0} if (donate_x and out_dtype == jnp.dtype(x.dtype)) else {}
    compiler_params = pltpu.CompilerParams(
        dimension_semantics=None,            # set per-path below
        vmem_limit_bytes=vmem_limit_bytes,
    )

    # ---------------- Path A: sublane- and lane-dense (B, S, D) blocks ----------------
    if d % 128 == 0 and s >= tile_align:
        # Bytes per sequence row across the x, out and pe blocks (all dense: D % 128 == 0
        # and tile_s is a multiple of every dtype's sublane count).
        per_row = d * (x_item + o_item + pe_item)
        if 2 * tile_align * per_row <= vmem_budget:
            tile_cap = max(tile_align, (s // tile_align) * tile_align)
            tile_budget = max(tile_align,
                              (vmem_budget // (2 * per_row)) // tile_align * tile_align)
            tile_target = max(tile_align,
                              (target_block_bytes // (d * x_item)) // tile_align * tile_align)
            tile_s = min(tile_cap, tile_budget, tile_target)
            # Ensure enough total grid steps for megacore sharding when there is work.
            if b * pl.cdiv(s, tile_s) < min_steps and s > tile_align:
                need_sblocks = -(-min_steps // b)
                tile_s = min(tile_s,
                             max(tile_align, (s // need_sblocks) // tile_align * tile_align))

            grid = (pl.cdiv(s, tile_s), b)   # batch axis innermost -> pe block stays resident
            return pl.pallas_call(
                _pe_add_kernel,
                out_shape=jax.ShapeDtypeStruct((b, s, d), out_dtype),
                grid_spec=pltpu.PrefetchScalarGridSpec(
                    num_scalar_prefetch=0,
                    grid=grid,
                    in_specs=[
                        pl.BlockSpec((1, tile_s, d), lambda si, bi: (bi, si, 0)),  # x tile
                        pl.BlockSpec((tile_s, d),    lambda si, bi: (si, 0)),      # pe tile (batch-invariant)
                    ],
                    out_specs=pl.BlockSpec((1, tile_s, d), lambda si, bi: (bi, si, 0)),
                ),
                compiler_params=pltpu.CompilerParams(
                    dimension_semantics=("parallel", "parallel"),
                    vmem_limit_bytes=vmem_limit_bytes,
                ),
                cost_estimate=cost,
                input_output_aliases=alias,
            )(x, pe_full)

    # ---------------- Path B: lane-dense flatten (B, S*D) ----------------
    # Sublane padding of the (B, tile_n) / (1, tile_n) blocks is accounted for explicitly
    # so small/odd batch sizes cannot silently overshoot scoped VMEM.
    x2 = x.reshape(b, n)
    pe_flat = pe_full.reshape(1, max_len * d)   # first n elements == pe[:s].ravel(), no slice copy

    pad_bx = _round_up(b, sub_x)
    pad_bo = _round_up(b, sub_o)
    per_col = pad_bx * x_item + pad_bo * o_item + sub_pe * pe_item   # padded bytes per lane column

    if 2 * 128 * per_col > vmem_budget:
        # Even a minimal 128-lane tile would not fit; just use a fused XLA add.
        return (x + pe_full[None, :s, :]).astype(out_dtype)

    tile_cap = max(128, (n // 128) * 128)                    # keep tile_n <= n (last block may overhang n%128)
    tile_budget = (vmem_budget // (2 * per_col)) // 128 * 128
    tile_target = (target_block_bytes // (pad_bx * x_item)) // 128 * 128
    tile_n = max(128, min(tile_cap, tile_budget, tile_target))
    if n >= min_steps * 128:
        tile_n = min(tile_n, max(128, (n // min_steps) // 128 * 128))

    grid = (pl.cdiv(n, tile_n),)
    out2 = pl.pallas_call(
        _pe_add_kernel,
        out_shape=jax.ShapeDtypeStruct((b, n), out_dtype),
        grid_spec=pltpu.PrefetchScalarGridSpec(
            num_scalar_prefetch=0,
            grid=grid,
            in_specs=[
                pl.BlockSpec((b, tile_n), lambda j: (0, j)),   # x tile (whole batch)
                pl.BlockSpec((1, tile_n), lambda j: (0, j)),   # pe tile (broadcast over batch)
            ],
            out_specs=pl.BlockSpec((b, tile_n), lambda j: (0, j)),
        ),
        compiler_params=pltpu.CompilerParams(
            dimension_semantics=("parallel",),
            vmem_limit_bytes=vmem_limit_bytes,
        ),
        cost_estimate=cost,
        input_output_aliases=alias,
    )(x2, pe_flat)
    return out2.reshape(b, s, d)


# ----------------------------------------------------------------------------- tests

if __name__ == "__main__":
    key = jax.random.PRNGKey(0)

    def check(x, pe_full, **kw):
        s = x.shape[1]
        out = jax.block_until_ready(positional_encoding(x, pe_full, **kw))
        ref = (x.astype(jnp.float32) + pe_full[None, :s, :].astype(jnp.float32)).astype(out.dtype)
        assert out.shape == x.shape, (out.shape, x.shape)
        assert jnp.allclose(out.astype(jnp.float32), ref.astype(jnp.float32),
                            atol=1e-5, rtol=1e-5), "mismatch vs reference"
        return out

    # 1) Spec-consistent small shape (batch=2, seq=8, embed=32), f32 -> Path B (lane flatten).
    k1, k2, k3, k4, k5 = jax.random.split(key, 5)
    x1 = jax.random.normal(k1, (2, 8, 32), dtype=jnp.float32)
    pe1 = _build_pe_table(32, 64)
    check(x1, pe1, min_pallas_bytes=0)

    # 2) D % 128 == 0 -> Path A (sublane- and lane-dense (B, S, D) blocks).
    x2 = jax.random.normal(k2, (2, 16, 128), dtype=jnp.float32)
    pe2 = _build_pe_table(128, 64)
    check(x2, pe2, min_pallas_bytes=0)

    # 3) S*D not a multiple of 128, multiple grid steps -> exercises edge masking of the
    #    last partial block (tiny forced target block size).
    x3 = jax.random.normal(k3, (3, 11, 24), dtype=jnp.float32)
    pe3 = _build_pe_table(24, 32)
    check(x3, pe3, min_pallas_bytes=0, target_block_bytes=4096)

    # 4) Mixed precision: bf16 x + f32 pe buffer -> f32 output (PyTorch promotion semantics).
    x4 = jax.random.normal(k4, (2, 16, 128), dtype=jnp.float32).astype(jnp.bfloat16)
    pe4 = _build_pe_table(128, 64)
    out4 = check(x4, pe4, min_pallas_bytes=0)
    assert out4.dtype == jnp.float32

    # 5) Tiny-shape fallback path (plain fused XLA add).
    x5 = jax.random.normal(k5, (1, 2, 8), dtype=jnp.float32)
    pe5 = _build_pe_table(8, 16)
    check(x5, pe5)

    print("KERNEL_OK")
</pallas_src>

<mosaic_0001>
module attributes {stable_mosaic.version = 11 : i64} {
  func.func @_pe_add_kernel(%arg0: i32, %arg1: memref<2x256xf32, #tpu.memory_space<vmem>>, %arg2: memref<1x256xf32, #tpu.memory_space<vmem>>, %arg3: memref<2x256xf32, #tpu.memory_space<vmem>>) attributes {dimension_semantics = [#tpu.dimension_semantics<parallel>], iteration_bounds = array<i64: 1>, scalar_prefetch = 0 : i64, scratch_operands = 0 : i64, tpu.core_type = #tpu.core_type<tc>, window_params = [{transform_indices = @transform_0, window_bounds = array<i64: 2, 256>}, {transform_indices = @transform_1, window_bounds = array<i64: 1, 256>}, {transform_indices = @transform_2, window_bounds = array<i64: 2, 256>}]} {
    %c0 = arith.constant 0 : index
    %c0_0 = arith.constant 0 : index
    %0 = vector.load %arg1[%c0, %c0_0] : memref<2x256xf32, #tpu.memory_space<vmem>>, vector<2x256xf32>
    %c0_1 = arith.constant 0 : index
    %c0_2 = arith.constant 0 : index
    %1 = vector.load %arg2[%c0_1, %c0_2] : memref<1x256xf32, #tpu.memory_space<vmem>>, vector<1x256xf32>
    %2 = vector.broadcast %1 : vector<1x256xf32> to vector<2x256xf32>
    %3 = arith.addf %0, %2 : vector<2x256xf32>
    %c0_3 = arith.constant 0 : index
    %c0_4 = arith.constant 0 : index
    %4 = vector.load %arg3[%c0_3, %c0_4] : memref<2x256xf32, #tpu.memory_space<vmem>>, vector<2x256xf32>
    tpu.vector_store %arg3[%c0_3, %c0_4], %3 {strides = array<i32>} : memref<2x256xf32, #tpu.memory_space<vmem>>, vector<2x256xf32>,
    return
  }
  func.func @transform_0(%arg0: i32) -> (i32, i32) {
    %c0_i32 = arith.constant 0 : i32
    %c0_i32_0 = arith.constant 0 : i32
    return %c0_i32, %arg0 : i32, i32
  }
  func.func @transform_1(%arg0: i32) -> (i32, i32) {
    %c0_i32 = arith.constant 0 : i32
    %c0_i32_0 = arith.constant 0 : i32
    return %c0_i32, %arg0 : i32, i32
  }
  func.func @transform_2(%arg0: i32) -> (i32, i32) {
    %c0_i32 = arith.constant 0 : i32
    %c0_i32_0 = arith.constant 0 : i32
    return %c0_i32, %arg0 : i32, i32
  }
}

</mosaic_0001>

<bundles_post_ra>
// kernel: tpu_custom_call.1
= control target key start
LH: loop header
LB: loop body
LE: loop exit
PB: predicated region body
PF: predicated region fallthrough
CT: control target
= control target key end

     0   :  { %7 = vsyncpa [#allocation3], 0  ;;  %s172_s0 = inlined_call_operand.hbm [shape: f32[2,256], index: 0, kind: input, shape index: {}]   ;;  %s173_s1 = inlined_call_operand.hbm [shape: f32[1,2048], index: 1, kind: input, shape index: {}]   ;;  %s174_s2 = inlined_call_operand.hbm [shape: f32[2,256], index: 2, kind: output, shape index: {}]  }
   0x1   :  { %8 = vsyncpa [#allocation6], 0 }
   0x2   :  { %9 = vsyncpa [#allocation4], 0  ;;  %s144_s9 = smov [#allocation2]   ;;  %s145_s11 = smov [#allocation5]  }
   0x3   :  { %s16_s10 = sshll.u32 %s144_s9, 4  ;;  %s26_s12 = sshll.u32 %s145_s11, 4  ;;  %s17_s10 = int_to_ptr.vmem [resolvable:$true] %s16_s10  ;;  %s27_s12 = int_to_ptr.vmem [resolvable:$true] %s26_s12 }
   0x4   :  { %s86_s13 = scalar_lea.vmem %s17_s10, 64  ;;  %p91_p1 = scmp.lt.s32.totalorder %s17_s10, %s17_s10 }
   0x5   :  { %p87_p0 = scmp.ne.s32.totalorder %s17_s10, %s86_s13  ;;  %p92_p2 = scmp.lt.s32.totalorder %s86_s13, %s86_s13 }
   0x7   :  { %p93_p3 = por %p92_p2, %p91_p1 }
   0x9   :  { %p94_p4 = pnand %p93_p3, %p87_p0 }
   0xb   :  { %97 = shalt.err (!%p94_p4)
}
   0xc   :  { %19 = dma.hbm_to_vmem [thread:$0]  %s172_s0, 64, %s17_s10, [#allocation3]  }
   0xd   :  { %s106_s16 = scalar_lea.vmem %s27_s12, 32  ;;  %p111_p6 = scmp.lt.s32.totalorder %s27_s12, %s27_s12 }
   0xe   :  { %p107_p5 = scmp.ne.s32.totalorder %s27_s12, %s106_s16  ;;  %p112_p7 = scmp.lt.s32.totalorder %s106_s16, %s106_s16 }
  0x10   :  { %p113_p8 = por %p112_p7, %p111_p6 }
  0x12   :  { %p114_p9 = pnand %p113_p8, %p107_p5 }
  0x14   :  { %117 = shalt.err (!%p114_p9)
}
  0x15   :  { %29 = dma.hbm_to_vmem [thread:$0]  %s173_s1, 32, %s27_s12, [#allocation6]  }
  0x16   :  { %138 = dma.done.wait [#allocation3], 64  }
  0x17   :  { %139 = vsyncadd [#allocation3], 4294967232 }
  0x18   :  { %140 = dma.done.wait [#allocation6], 32  }
  0x19   :  { %141 = vsyncadd [#allocation6], 4294967264  ;;  %v39_v0 = vlaneseq  ;;  %v146_v1 = vmov 1983009808   ;;  %v37_v7 = vld [vmem:[#allocation5] sm:$0x3] }
  0x1a   :  { %v49_v2 = vunpack.c.l.s4 %v146_v1  ;;  %v36_v12 = vld [vmem:[#allocation2] sm:$0xf]  ;;  %s147_s0 = smov [#allocation7]  }
  0x1b   :  { %v40_v3 = vshrl.u32 %v39_v0, 7  ;;  %s64_s19 = sshll.u32 %s147_s0, 4  ;;  %s65_s19 = int_to_ptr.vmem [resolvable:$true] %s64_s19 }
  0x1c   :  { %v50_v6 = vunpack.c.0.s8 %v49_v2  ;;  %s118_s1 = scalar_lea.vmem %s65_s19, 64  ;;  %p123_p11 = scmp.lt.s32.totalorder %s65_s19, %s65_s19 }
  0x1d   :  { %v41_v4 = vsub.s32 0, %v40_v3  ;;  %v45_v5 = vsub.s32 1, %v40_v3  ;;  %p119_p10 = scmp.ne.s32.totalorder %s65_s19, %s118_s1  ;;  %p124_p12 = scmp.lt.s32.totalorder %s118_s1, %s118_s1 }
  0x1e   :  { %v53_v10 = vsub.s32 %v50_v6, %v40_v3 }
  0x1f   :  { %v42_v8 = vrot.slane %v37_v7, %v41_v4  ;;  %v46_v9 = vrot.slane %v37_v7, %v45_v5  ;;  %p125_p13 = por %p124_p12, %p123_p11 }
  0x21   :  { %v47_v11 = vcombine.low %v42_v8, %v46_v9  ;;  %p126_p0 = pnand %p125_p13, %p119_p10 }
  0x23   :  { %v54_v13 = vrot.slane %v47_v11, %v53_v10 }
  0x25   :  { %v56_v14 = vadd.f32 %v54_v13, %v36_v12 }
  0x27   :  { %57 = vst [vmem:[#allocation7] sm:$0xf] %v56_v14 }
  0x28   :  { %129 = shalt.err (!%p126_p0)
}
  0x29   :  { %67 = dma.vmem_to_hbm [thread:$0]  %s65_s19, 64, %s174_s2, [#allocation4]  }
  0x2a   :  { %142 = dma.done.wait [#allocation4], 64  }
  0x2b   :  { %143 = vsyncadd [#allocation4], 4294967232 }
  0x2c   :  { %71 = vsyncpa [#allocation3], 1 }
  0x2d   :  { %72 = vsyncpa [#allocation6], 1 }
  0x2e   :  { %73 = vsyncpa [#allocation4], 1 }

</bundles_post_ra>
